<compile_context>
chip_gen: v5e
topology: v5e:2x2
jax: 0.10.0
libtpu: 0.0.40
codegen_flags: <defaults>
</compile_context>

<pallas_src>
import jax
import jax.numpy as jnp
from jax.experimental import pallas as pl
from jax.experimental.pallas import tpu as pltpu


def _round_up(v, m):
    return ((v + m - 1) // m) * m


def _round_down(v, m):
    return (v // m) * m


def _mlp_kernel(x_ref, w1_ref, w2t_ref, w3t_ref, b_ref, ot_ref):
    # x_ref : (bt, D)  f32  streamed batch tile (natural layout, batch on sublanes)
    # w1_ref: (D, H1)  bf16 ; w2t_ref: (H2, H1) bf16 ; w3t_ref: (1, H2) bf16
    # b_ref : (H1+H2+1, 1) f32 fused biases ; ot_ref: (1, bt) f32 lane-dense output
    H1 = w1_ref.shape[1]
    H2 = w2t_ref.shape[0]

    x = x_ref[...].astype(jnp.bfloat16)            # cast in-kernel (hidden under DMA)
    b = b_ref[...]                                  # (H1+H2+1, 1) f32

    # h1^T[a, n] = sum_d w1[d, a] * x[n, d]  -> (H1, bt); batch moves to lanes here,
    # without materializing any host-side transpose of x.
    h1 = jax.lax.dot_general(
        w1_ref[...], x,
        dimension_numbers=(((0,), (1,)), ((), ())),
        preferred_element_type=jnp.float32)
    h1 = jnp.maximum(h1 + b[0:H1, :], 0.0)          # (H1, bt) f32

    h2 = jnp.dot(w2t_ref[...], h1, preferred_element_type=jnp.float32)
    h2 = jnp.maximum(h2 + b[H1:H1 + H2, :], 0.0)    # (H2, bt) f32

    out = jnp.dot(w3t_ref[...], h2, preferred_element_type=jnp.float32)
    ot_ref[...] = (out + b[H1 + H2:, :]).astype(ot_ref.dtype)   # (1, bt) lane-dense


def _pick_batch_tile(B, D, itemsize, *, x_vmem_budget=12 * 1024 * 1024):
    """Largest batch tile whose double-buffered x stream fits the VMEM budget.

    VMEM cost per streamed batch row uses lane-padded accounting (last dim pads to
    a multiple of 128), so small-D tiles don't silently blow VMEM. Budget is
    conservative so total kernel VMEM stays well under 32 MiB (v7x default scoped
    limit; v7x has only 64 MiB physical).
    """
    row_bytes = _round_up(D, 128) * itemsize
    bt = max(128, _round_down(x_vmem_budget // (2 * row_bytes), 128))
    bt = min(bt, _round_up(B, 128))                 # never bigger than the batch
    if B > 128:
        # v7x megacore: keep >= 2 grid steps so both TensorCores get batch tiles.
        bt = min(bt, max(128, _round_up(pl.cdiv(B, 2), 128)))
    return bt


def mlp_forward(x, params):
    """Fused MLP forward.

    x: (B, D) float32 (PyTorch row-major convention).
    params: dict of w1(D,32), b1(1,32), w2(32,16), b2(1,16), w3(16,1), b3(1,1), f32.
    Returns (B, 1) float32.
    """
    B, D = x.shape
    H1 = params["w1"].shape[1]   # 32
    H2 = params["w2"].shape[1]   # 16

    # Tiny constant-size weight prep (negligible; ideally hoisted/done once).
    w1 = params["w1"].astype(jnp.bfloat16)                     # (D, H1)
    w2t = params["w2"].T.astype(jnp.bfloat16)                  # (H2, H1)
    w3t = params["w3"].T.astype(jnp.bfloat16)                  # (1, H2)
    b_all = jnp.concatenate(
        [params["b1"].reshape(H1, 1),
         params["b2"].reshape(H2, 1),
         params["b3"].reshape(1, 1)], axis=0).astype(jnp.float32)   # (H1+H2+1, 1)

    # x streams in natural (B, D) layout: no pad/transpose/cast pre-pass. Only the
    # tiny-batch case gets padded up to one full lane group (negligible; such
    # batches should route to plain XLA in production anyway).
    xk = x
    if B < 128:
        xk = jnp.pad(x, ((0, 128 - B), (0, 0)))
    Bk = xk.shape[0]

    bt = _pick_batch_tile(Bk, D, jnp.dtype(xk.dtype).itemsize)
    grid = (pl.cdiv(Bk, bt),)
    const = lambda i: (0, 0)   # weights/biases: same (full) block every grid step

    out_t = pl.pallas_call(
        _mlp_kernel,
        out_shape=jax.ShapeDtypeStruct((1, Bk), jnp.float32),
        grid=grid,
        in_specs=[
            pl.BlockSpec((bt, D), lambda i: (i, 0)),        # streamed x tile
            pl.BlockSpec((D, H1), const),                   # VMEM-resident weights
            pl.BlockSpec((H2, H1), const),
            pl.BlockSpec((1, H2), const),
            pl.BlockSpec((H1 + H2 + 1, 1), const),          # fused biases
        ],
        out_specs=pl.BlockSpec((1, bt), lambda i: (0, i)),  # lane-dense output slab
        compiler_params=pltpu.CompilerParams(
            dimension_semantics=("parallel",),              # split batch tiles across TCs (v7x)
            vmem_limit_bytes=32 * 1024 * 1024,              # explicit: v5e default is 16 MiB
        ),
    )(xk, w1, w2t, w3t, b_all)

    return out_t[0, :B].reshape(B, 1)


def init_params(key, input_dim):
    """Deterministic init matching nn.Linear shapes (weights stored as (in, out))."""
    k1, k2, k3, k4, k5, k6 = jax.random.split(key, 6)

    def linear_init(kw, kb, fan_in, fan_out):
        bound = 1.0 / jnp.sqrt(fan_in)
        w = jax.random.uniform(kw, (fan_in, fan_out), jnp.float32, -bound, bound)
        b = jax.random.uniform(kb, (1, fan_out), jnp.float32, -bound, bound)
        return w, b

    w1, b1 = linear_init(k1, k2, input_dim, 32)
    w2, b2 = linear_init(k3, k4, 32, 16)
    w3, b3 = linear_init(k5, k6, 16, 1)
    return {"w1": w1, "b1": b1, "w2": w2, "b2": b2, "w3": w3, "b3": b3}


def _reference(x, p):
    # Same math as the kernel: bf16-rounded x/weights, f32 accumulation/biases.
    bf = lambda a: a.astype(jnp.bfloat16).astype(jnp.float32)
    h1 = jnp.maximum(bf(x) @ bf(p["w1"]) + p["b1"], 0.0)
    h2 = jnp.maximum(h1 @ bf(p["w2"]) + p["b2"], 0.0)
    return h2 @ bf(p["w3"]) + p["b3"]


if __name__ == "__main__":
    key = jax.random.PRNGKey(0)
    kx, kp = jax.random.split(key)

    # Main test: small D (16), B=300 -> 2 grid steps with an uneven tail tile
    # (exercises the masked-edge path and the megacore >=2-step rule).
    B, D = 300, 16
    x = jax.random.normal(kx, (B, D), dtype=jnp.float32)
    params = init_params(kp, D)

    out = jax.block_until_ready(mlp_forward(x, params))
    assert out.shape == (B, 1)
    ref = _reference(x, params)
    assert jnp.allclose(out, ref, atol=1e-4, rtol=1e-4), float(
        jnp.max(jnp.abs(out - ref)))

    # Tiny-batch path (padded to one full lane group) still correct.
    x_small = jax.random.normal(jax.random.PRNGKey(1), (8, D), dtype=jnp.float32)
    out_small = jax.block_until_ready(mlp_forward(x_small, params))
    assert out_small.shape == (8, 1)
    assert jnp.allclose(out_small, _reference(x_small, params), atol=1e-4, rtol=1e-4)

    # Wider feature dim (lane-dense x tiles), still small shapes; 2 grid steps.
    B2, D2 = 640, 128
    params2 = init_params(jax.random.PRNGKey(2), D2)
    x2 = jax.random.normal(jax.random.PRNGKey(3), (B2, D2), dtype=jnp.float32)
    out2 = jax.block_until_ready(mlp_forward(x2, params2))
    assert out2.shape == (B2, 1)
    assert jnp.allclose(out2, _reference(x2, params2), atol=1e-4, rtol=1e-4)

    print("KERNEL_OK")
</pallas_src>

<mosaic_0001>
module attributes {stable_mosaic.version = 11 : i64} {
  func.func @_mlp_kernel(%arg0: i32, %arg1: memref<256x16xf32, #tpu.memory_space<vmem>>, %arg2: memref<16x32xbf16, #tpu.memory_space<vmem>>, %arg3: memref<16x32xbf16, #tpu.memory_space<vmem>>, %arg4: memref<1x16xbf16, #tpu.memory_space<vmem>>, %arg5: memref<49x1xf32, #tpu.memory_space<vmem>>, %arg6: memref<1x256xf32, #tpu.memory_space<vmem>>) attributes {dimension_semantics = [#tpu.dimension_semantics<parallel>], iteration_bounds = array<i64: 2>, scalar_prefetch = 0 : i64, scratch_operands = 0 : i64, tpu.core_type = #tpu.core_type<tc>, window_params = [{transform_indices = @transform_0, window_bounds = array<i64: 256, 16>}, {pipeline_mode = #tpu.pipeline_mode<synchronous>, transform_indices = @transform_1, window_bounds = array<i64: 16, 32>}, {pipeline_mode = #tpu.pipeline_mode<synchronous>, transform_indices = @transform_2, window_bounds = array<i64: 16, 32>}, {pipeline_mode = #tpu.pipeline_mode<synchronous>, transform_indices = @transform_3, window_bounds = array<i64: 1, 16>}, {pipeline_mode = #tpu.pipeline_mode<synchronous>, transform_indices = @transform_4, window_bounds = array<i64: 49, 1>}, {transform_indices = @transform_5, window_bounds = array<i64: 1, 256>}]} {
    %c0 = arith.constant 0 : index
    %c0_0 = arith.constant 0 : index
    %0 = vector.load %arg1[%c0, %c0_0] : memref<256x16xf32, #tpu.memory_space<vmem>>, vector<256x16xf32>
    %1 = arith.truncf %0 : vector<256x16xf32> to vector<256x16xbf16>
    %c0_1 = arith.constant 0 : index
    %c0_2 = arith.constant 0 : index
    %2 = vector.load %arg5[%c0_1, %c0_2] : memref<49x1xf32, #tpu.memory_space<vmem>>, vector<49x1xf32>
    %c0_3 = arith.constant 0 : index
    %c0_4 = arith.constant 0 : index
    %3 = vector.load %arg2[%c0_3, %c0_4] : memref<16x32xbf16, #tpu.memory_space<vmem>>, vector<16x32xbf16>
    %cst = arith.constant dense<0.000000e+00> : vector<32x256xf32>
    %4 = tpu.matmul %3, %1, %cst {dimension_numbers = #tpu.dot_dimension_numbers<[0], [1], [1], [0], [0, 1, 1, 0], [], []>} : vector<16x32xbf16>, vector<256x16xbf16>, vector<32x256xf32> -> vector<32x256xf32>
    %5 = vector.extract_strided_slice %2 {offsets = [0, 0], sizes = [32, 1], strides = [1, 1]} : vector<49x1xf32> to vector<32x1xf32>
    %6 = vector.broadcast %5 : vector<32x1xf32> to vector<32x256xf32>
    %7 = arith.addf %4, %6 : vector<32x256xf32>
    %cst_5 = arith.constant 0.000000e+00 : f32
    %8 = vector.broadcast %cst_5 : f32 to vector<32x256xf32>
    %9 = arith.maximumf %7, %8 : vector<32x256xf32>
    %c0_6 = arith.constant 0 : index
    %c0_7 = arith.constant 0 : index
    %10 = vector.load %arg3[%c0_6, %c0_7] : memref<16x32xbf16, #tpu.memory_space<vmem>>, vector<16x32xbf16>
    %cst_8 = arith.constant dense<0.000000e+00> : vector<16x256xf32>
    %11 = tpu.matmul %10, %9, %cst_8 {dimension_numbers = #tpu.dot_dimension_numbers<[1], [0], [0], [1], [0, 0, 1, 1], [], []>} : vector<16x32xbf16>, vector<32x256xf32>, vector<16x256xf32> -> vector<16x256xf32>
    %12 = vector.extract_strided_slice %2 {offsets = [32, 0], sizes = [16, 1], strides = [1, 1]} : vector<49x1xf32> to vector<16x1xf32>
    %13 = vector.broadcast %12 : vector<16x1xf32> to vector<16x256xf32>
    %14 = arith.addf %11, %13 : vector<16x256xf32>
    %cst_9 = arith.constant 0.000000e+00 : f32
    %15 = vector.broadcast %cst_9 : f32 to vector<16x256xf32>
    %16 = arith.maximumf %14, %15 : vector<16x256xf32>
    %c0_10 = arith.constant 0 : index
    %c0_11 = arith.constant 0 : index
    %17 = vector.load %arg4[%c0_10, %c0_11] : memref<1x16xbf16, #tpu.memory_space<vmem>>, vector<1x16xbf16>
    %cst_12 = arith.constant dense<0.000000e+00> : vector<1x256xf32>
    %18 = tpu.matmul %17, %16, %cst_12 {dimension_numbers = #tpu.dot_dimension_numbers<[1], [0], [0], [1], [0, 0, 1, 1], [], []>} : vector<1x16xbf16>, vector<16x256xf32>, vector<1x256xf32> -> vector<1x256xf32>
    %19 = vector.extract_strided_slice %2 {offsets = [48, 0], sizes = [1, 1], strides = [1, 1]} : vector<49x1xf32> to vector<1x1xf32>
    %20 = vector.broadcast %19 : vector<1x1xf32> to vector<1x256xf32>
    %21 = arith.addf %18, %20 : vector<1x256xf32>
    %c0_13 = arith.constant 0 : index
    %c0_14 = arith.constant 0 : index
    %22 = vector.load %arg6[%c0_13, %c0_14] : memref<1x256xf32, #tpu.memory_space<vmem>>, vector<1x256xf32>
    tpu.vector_store %arg6[%c0_13, %c0_14], %21 {strides = array<i32>} : memref<1x256xf32, #tpu.memory_space<vmem>>, vector<1x256xf32>,
    return
  }
  func.func @transform_0(%arg0: i32) -> (i32, i32) {
    %c0_i32 = arith.constant 0 : i32
    %c0_i32_0 = arith.constant 0 : i32
    return %arg0, %c0_i32 : i32, i32
  }
  func.func @transform_1(%arg0: i32) -> (i32, i32) {
    %c0_i32 = arith.constant 0 : i32
    %c0_i32_0 = arith.constant 0 : i32
    %c0_i32_1 = arith.constant 0 : i32
    return %c0_i32, %c0_i32_0 : i32, i32
  }
  func.func @transform_2(%arg0: i32) -> (i32, i32) {
    %c0_i32 = arith.constant 0 : i32
    %c0_i32_0 = arith.constant 0 : i32
    %c0_i32_1 = arith.constant 0 : i32
    return %c0_i32, %c0_i32_0 : i32, i32
  }
  func.func @transform_3(%arg0: i32) -> (i32, i32) {
    %c0_i32 = arith.constant 0 : i32
    %c0_i32_0 = arith.constant 0 : i32
    %c0_i32_1 = arith.constant 0 : i32
    return %c0_i32, %c0_i32_0 : i32, i32
  }
  func.func @transform_4(%arg0: i32) -> (i32, i32) {
    %c0_i32 = arith.constant 0 : i32
    %c0_i32_0 = arith.constant 0 : i32
    %c0_i32_1 = arith.constant 0 : i32
    return %c0_i32, %c0_i32_0 : i32, i32
  }
  func.func @transform_5(%arg0: i32) -> (i32, i32) {
    %c0_i32 = arith.constant 0 : i32
    %c0_i32_0 = arith.constant 0 : i32
    return %c0_i32, %arg0 : i32, i32
  }
}

</mosaic_0001>

<bundles_post_ra>
// kernel: tpu_custom_call.1
= control target key start
LH: loop header
LB: loop body
LE: loop exit
PB: predicated region body
PF: predicated region fallthrough
CT: control target
= control target key end

     0   :  { %10 = vsyncpa [#allocation3], 0  ;;  %s1034_s0 = inlined_call_operand.vmem [shape: f32[300,16], index: 0, kind: input, shape index: {}]   ;;  %s1035_s1 = inlined_call_operand.vmem [shape: bf16[16,32], index: 1, kind: input, shape index: {}]   ;;  %s1036_s2 = inlined_call_operand.vmem [shape: bf16[16,32], index: 2, kind: input, shape index: {}]   ;;  %s1037_s3 = inlined_call_operand.vmem [shape: bf16[1,16], index: 3, kind: input, shape index: {}]   ;;  %s1038_s4 = inlined_call_operand.vmem [shape: f32[49,1], index: 4, kind: input, shape index: {}]   ;;  %s1039_s5 = inlined_call_operand.hbm [shape: f32[1,300], index: 5, kind: output, shape index: {}]  }
   0x1   :  { %12 = vsyncpa [#allocation3 + $0x1], 0  ;;  %s840_s18 = smov 0   ;;  %s842_s19 = smov 0  }
   0x2   :  { %s844_s20 = smov 0   ;;  %s846_s21 = smov 0  }
   0x3 LB: > { %s861_s22 = sadd.s32 4294967295, %s806_s21   ;;  %s661_s23 = sadd.s32 4294967294, %s806_s21   ;;  %s806_s21 = sphi %s846_s21, %s1045_s21   ;;  %s802_s20 = sphi %s844_s20, %s1044_s20   ;;  %s798_s19 = sphi %s842_s19, %s1043_s19   ;;  %s794_s18 = sphi %s840_s18, %s1042_s18  }
   0x4   : > { %s865_s24 = sadd.s32 1, %s806_s21   ;;  %s135_s25 = sadd.s32 1, %s802_s20 }
   0x5   : > { %s132_s26 = ssub.s32 %s806_s21, %s865_s24  ;;  %p145_p0 = scmp.ne.s32.totalorder %s802_s20, %s798_s19 }
   0x6   : > { %p133_p1 = scmp.eq.s32.totalorder %s132_s26, 0  ;;  %p146_p2 = scmp.eq.s32.totalorder %s861_s22, 1 }
   0x7   : > { %p151_p3 = scmp.ne.s32.totalorder %s798_s19, %s794_s18  ;;  %p152_p4 = scmp.eq.s32.totalorder %s661_s23, 1 }
   0x8   : > { %s876_s27 = scalar_select %p133_p1, %s802_s20, %s135_s25  }
   0x9   : > { %p878_p5 = por %p146_p2, %p145_p0  ;;  %p882_p6 = por %p152_p4, %p151_p3 }
   0xa   : > { %p664_p7 = scmp.ge.s32.totalorder %s806_s21, 1  ;;  %p199_p8 = scmp.lt.s32.totalorder %s806_s21, 3 }
   0xc   : > { %p200_p9 = pnand %p664_p7, %p199_p8 }
   0xd   : > { %s666_s7 = sshll.u32 (!%p200_p9), %s861_s22, 5  ;;  %s228_s14 = sand.u32 (!%p200_p9), 1, %s798_s19  }
   0xe   : > { %203 = sbr.rel (%p200_p9) target bundleno = 670 (0x29e), region = 40  ;;  %p236_p10 = scmp.lt.s32.totalorder (!%p200_p9), %s666_s7, 37 }
   0xf   : > { %s665_s15 = sshll.u32 (!%p200_p9), %s228_s14, 1  ;;  %s979_s17 = scalar_lea.sflag (!%p200_p9), [#allocation3], %s228_s14 }
  0x10   : > { %s230_s16 = scalar_lea.vmem (!%p200_p9), [#allocation2], %s665_s15 }
  0x13   : > { %v689_v0 = vld [vmem:[%s1035_s1] sm:$0xff]  ;;  %s1047_s7 = smov (!%p236_p10, %s666_s7), 37  ;;  %vm349_vm0 = vcmask 130048   ;;  %vm467_vm1 = vcmask 261120   ;;  %vm573_vm2 = vcmask 1040384   ;;  %s685_s23 = sshll.u32 (%p878_p5), %s861_s22, 1 }
  0x14   : > { %333 = vxpose.xlu0.c.b16.start.end [1/1] (short) (narrow) %v689_v0, 32  ;;  %s667_s8 = sshll.u32 %s1047_s7, 3  ;;  %s590_s25 = ssub.s32 (%p878_p5), 3, %s685_s23 }
  0x15   : > { %s895_s11 = scalar_lea.vmem %s1034_s0, %s667_s8  ;;  %p591_p11 = scmp.lt.s32.totalorder (%p878_p5), %s590_s25, 2 }
  0x16   : > { %v264_v1 = vld [vmem:[%s895_s11 + $0x70] sm:$0xff]  ;;  %v265_v2 = vld [vmem:[%s895_s11 + $0x78] sm:$0xff]  ;;  %v262_v7 = vld [vmem:[%s895_s11 + $0x60] sm:$0xff] }
  0x17   : > { %v280_v3 = vld [vmem:[%s895_s11 + $0xf0] sm:$0xff]  ;;  %v289_v4 = vpack.c.bf16 %v265_v2, %v264_v1  ;;  %v281_v5 = vld [vmem:[%s895_s11 + $0xf8] sm:$0xff]  ;;  %v263_v8 = vld [vmem:[%s895_s11 + $0x68] sm:$0xff]  ;;  %v808_v2 = vmov 0  }
  0x18   : > { %v297_v6 = vpack.c.bf16 %v281_v5, %v280_v3  ;;  %v278_v10 = vld [vmem:[%s895_s11 + $0xe0] sm:$0xff]  ;;  %v279_v11 = vld [vmem:[%s895_s11 + $0xe8] sm:$0xff]  ;;  %v288_v13 = vpack.c.bf16 %v263_v8, %v262_v7  ;;  %v260_v17 = vld [vmem:[%s895_s11 + $0x50] sm:$0xff]  ;;  %731 = vset.pattern.permute.xlu1 %v808_v2  ;;  %732 = vset.pattern.permute.xlu2 %v808_v2 }
  0x19   : > { %v378_v9 = vsel %vm349_vm0, %v289_v4, 0  ;;  %v296_v14 = vpack.c.bf16 %v279_v11, %v278_v10  ;;  %v261_v18 = vld [vmem:[%s895_s11 + $0x58] sm:$0xff]  ;;  %v276_v19 = vld [vmem:[%s895_s11 + $0xd0] sm:$0xff]  ;;  %v258_v25 = vld [vmem:[%s895_s11 + $0x40] sm:$0xff] }
  0x1a   : > { %404 = vmatpush.bf16.xpose.msra.mxu0 %v378_v9  ;;  %v402_v12 = vsel %vm349_vm0, %v297_v6, 0  ;;  %v375_v15 = vsel %vm349_vm0, %v288_v13, 0  ;;  %v277_v20 = vld [vmem:[%s895_s11 + $0xd8] sm:$0xff]  ;;  %v287_v21 = vpack.c.bf16 %v261_v18, %v260_v17  ;;  %v259_v26 = vld [vmem:[%s895_s11 + $0x48] sm:$0xff]  ;;  %v274_v27 = vld [vmem:[%s895_s11 + $0xc0] sm:$0xff] }
  0x1b   : > { %423 = vmatpush.bf16.xpose.msra.mxu1 %v402_v12  ;;  %v399_v16 = vsel %vm349_vm0, %v296_v14, 0  ;;  %v295_v22 = vpack.c.bf16 %v277_v20, %v276_v19  ;;  %v275_v28 = vld [vmem:[%s895_s11 + $0xc8] sm:$0xff]  ;;  %v286_v29 = vpack.c.bf16 %v259_v26, %v258_v25  ;;  %v256_v33 = vld [vmem:[%s895_s11 + $0x30] sm:$0xff]  ;;  %v257_v34 = vld [vmem:[%s895_s11 + $0x38] sm:$0xff] }
  0x1c   : > { %v372_v23 = vsel %vm349_vm0, %v287_v21, 0  ;;  %v294_v30 = vpack.c.bf16 %v275_v28, %v274_v27  ;;  %v272_v35 = vld [vmem:[%s895_s11 + $0xb0] sm:$0xff]  ;;  %v273_v36 = vld [vmem:[%s895_s11 + $0xb8] sm:$0xff]  ;;  %v285_v37 = vpack.c.bf16 %v257_v34, %v256_v33  ;;  %v254_v41 = vld [vmem:[%s895_s11 + $0x20] sm:$0xff] }
  0x1d   : > { %v396_v24 = vsel %vm349_vm0, %v295_v22, 0  ;;  %v369_v31 = vsel %vm349_vm0, %v286_v29, 0  ;;  %v293_v38 = vpack.c.bf16 %v273_v36, %v272_v35  ;;  %v255_v42 = vld [vmem:[%s895_s11 + $0x28] sm:$0xff]  ;;  %v270_v43 = vld [vmem:[%s895_s11 + $0xa0] sm:$0xff]  ;;  %v252_v49 = vld [vmem:[%s895_s11 + $0x10] sm:$0xff] }
  0x1e   : > { %v393_v32 = vsel %vm349_vm0, %v294_v30, 0  ;;  %v366_v39 = vsel %vm349_vm0, %v285_v37, 0  ;;  %v271_v44 = vld [vmem:[%s895_s11 + $0xa8] sm:$0xff]  ;;  %v284_v45 = vpack.c.bf16 %v255_v42, %v254_v41  ;;  %v253_v50 = vld [vmem:[%s895_s11 + $0x18] sm:$0xff]  ;;  %v268_v51 = vld [vmem:[%s895_s11 + $0x90] sm:$0xff] }
  0x1f   : > { %v390_v40 = vsel %vm349_vm0, %v293_v38, 0  ;;  %v292_v46 = vpack.c.bf16 %v271_v44, %v270_v43  ;;  %v269_v52 = vld [vmem:[%s895_s11 + $0x98] sm:$0xff]  ;;  %v283_v53 = vpack.c.bf16 %v253_v50, %v252_v49  ;;  %v250_v57 = vld [vmem:[%s895_s11] sm:$0xff]  ;;  %v251_v58 = vld [vmem:[%s895_s11 + $0x8] sm:$0xff] }
  0x20   : > { %v363_v47 = vsel %vm349_vm0, %v284_v45, 0  ;;  %v291_v54 = vpack.c.bf16 %v269_v52, %v268_v51  ;;  %v266_v59 = vld [vmem:[%s895_s11 + $0x80] sm:$0xff]  ;;  %v267_v60 = vld [vmem:[%s895_s11 + $0x88] sm:$0xff]  ;;  %v282_v61 = vpack.c.bf16 %v251_v58, %v250_v57  ;;  %v300_v1 = vld [vmem:[%s1038_s4 + $0x10] sm:$0xff] }
  0x21   : > { %v387_v48 = vsel %vm349_vm0, %v292_v46, 0  ;;  %v360_v55 = vsel %vm349_vm0, %v283_v53, 0  ;;  %v290_v62 = vpack.c.bf16 %v267_v60, %v266_v59  ;;  %319 = vperm.xlu1 %731, %v300_v1   ;;  %v299_v3 = vld [vmem:[%s1038_s4 + $0x8] sm:$0xff]  ;;  %v301_v4 = vld [vmem:[%s1038_s4 + $0x18] sm:$0xff]  ;;  %v298_v5 = vld [vmem:[%s1038_s4] sm:$0xff] }
  0x22   : > { %405 = vmatpush.bf16.xpose.msra.mxu0 %v375_v15  ;;  %v384_v56 = vsel %vm349_vm0, %v291_v54, 0  ;;  %v357_v63 = vsel %vm349_vm0, %v282_v61, 0  ;;  %309 = vperm.xlu2 %732, %v298_v5   ;;  %v302_v6 = vld [vmem:[%s1038_s4 + $0x20] sm:$0xff]  ;;  %v303_v7 = vld [vmem:[%s1038_s4 + $0x28] sm:$0xff]  ;;  %v304_v9 = vld [vmem:[%s1038_s4 + $0x30] sm:$0x1] }
  0x23   : > { %424 = vmatpush.bf16.xpose.msra.mxu1 %v399_v16  ;;  %v381_v0 = vsel %vm349_vm0, %v290_v62, 0  ;;  %v690_v37 = vld [vmem:[%s1036_s2] sm:$0xff] }
  0x24   : > { %v519_v54 = vld [vmem:[%s1037_s3] sm:$0x1] }
  0x29   : > { %314 = vperm.xlu1 %731, %v299_v3  }
  0x2a   : > { %406 = vmatpush.bf16.xpose.msra.mxu0 %v372_v23  ;;  %459 = vperm.xlu2 %732, %v303_v7  }
  0x2b   : > { %425 = vmatpush.bf16.xpose.msra.mxu1 %v396_v24 }
  0x31   : > { %454 = vperm.xlu1 %731, %v302_v6  }
  0x32   : > { %407 = vmatpush.bf16.xpose.msra.mxu0 %v369_v31  ;;  %522 = vperm.xlu2 %732, %v304_v9  }
  0x33   : > { %426 = vmatpush.bf16.xpose.msra.mxu1 %v393_v32 }
  0x3a   : > { %408 = vmatpush.bf16.xpose.msra.mxu0 %v366_v39 }
  0x3b   : > { %427 = vmatpush.bf16.xpose.msra.mxu1 %v390_v40 }
  0x42   : > { %409 = vmatpush.bf16.xpose.msra.mxu0 %v363_v47 }
  0x43   : > { %428 = vmatpush.bf16.xpose.msra.mxu1 %v387_v48 }
  0x4a   : > { %410 = vmatpush.bf16.xpose.msra.mxu0 %v360_v55 }
  0x4b   : > { %429 = vmatpush.bf16.xpose.msra.mxu1 %v384_v56  ;;  %v576_v56 = vlaneseq }
  0x4d   : > { %vm578_vm3 = vcmp.lt.s32.totalorder %v576_v56, 256 }
  0x52   : > { %411 = vmatpush.bf16.xpose.msra.mxu0 %v357_v63 }
  0x53   : > { %430 = vmatpush.bf16.xpose.msra.mxu1 %v381_v0 }
  0x7b   : > { %730 = vset.pattern.permute.xlu0 %v808_v2 }
  0x7c   : > { %v310_v26 = vpop.permute.xlu2 %309 }
  0x84   : > { %v460_v43 = vpop.permute.xlu2 %459 }
  0x8c   : > { %v523_v55 = vpop.permute.xlu2 %522 }
  0x92   : > { %324 = vperm.xlu0 %730, %v301_v4  }
  0x93   : > { %v320_v15 = vpop.permute.xlu1 %319 }
  0x9b   : > { %v315_v19 = vpop.permute.xlu1 %314 }
  0xa3   : > { %v455_v42 = vpop.permute.xlu1 %454 }
  0xc0   : > { %v341_v8 = vpop.trf.xlu0 }
  0xc1   : > { %672 = vmatmul.msk.bf16.vlgmr.msra.gmra.mxu0 %vm349_vm0, %v341_v8  ;;  %674 = vmatmul.msk.bf16.vlgmr.msra.gmra.mxu1 %vm349_vm0, %v341_v8 }
  0xd0   : > { %v342_v10 = vpop.trf.xlu0 }
  0xd1   : > { %673 = vmatmul.msk.bf16.gmra.mxu0 %vm349_vm0, %v342_v10  ;;  %675 = vmatmul.msk.bf16.gmra.mxu1 %vm349_vm0, %v342_v10 }
 0x104   : > { %v325_v18 = vpop.permute.xlu0 %324 }
 0x13e   : > { %v413_v11 = vpop.f32.mrf.mxu0  ;;  %v432_v12 = vpop.f32.mrf.mxu1 }
 0x13f   : > { %v414_v31 = vadd.f32 %v413_v11, %v310_v26  ;;  %v433_v32 = vadd.f32 %v432_v12, %v310_v26 }
 0x141   : > { %v442_v38 = vmax.f32 %v414_v31, 0.0  ;;  %v443_v39 = vmax.f32 %v433_v32, 0.0 }
 0x146   : > { %v415_v13 = vpop.f32.mrf.mxu0  ;;  %v434_v14 = vpop.f32.mrf.mxu1 }
 0x147   : > { %v416_v27 = vadd.f32 %v415_v13, %v315_v19  ;;  %v435_v28 = vadd.f32 %v434_v14, %v315_v19 }
 0x149   : > { %v444_v35 = vmax.f32 %v416_v27, 0.0  ;;  %v445_v36 = vmax.f32 %v435_v28, 0.0 }
 0x14e   : > { %v418_v16 = vpop.f32.mrf.mxu0  ;;  %v437_v17 = vpop.f32.mrf.mxu1 }
 0x14f   : > { %v419_v22 = vadd.f32 %v418_v16, %v320_v15  ;;  %v438_v23 = vadd.f32 %v437_v17, %v320_v15 }
 0x151   : > { %v446_v33 = vmax.f32 %v419_v22, 0.0  ;;  %v447_v34 = vmax.f32 %v438_v23, 0.0 }
 0x156   : > { %v420_v20 = vpop.f32.mrf.mxu0  ;;  %v439_v21 = vpop.f32.mrf.mxu1 }
 0x157   : > { %v421_v24 = vadd.f32 %v420_v20, %v325_v18  ;;  %v440_v25 = vadd.f32 %v439_v21, %v325_v18 }
 0x159   : > { %v448_v29 = vmax.f32 %v421_v24, 0.0  ;;  %v449_v30 = vmax.f32 %v440_v25, 0.0 }
 0x15b   : > { %483 = vmatpush.msra.mxu2 %v448_v29  ;;  %505 = vmatpush.msra.mxu3 %v449_v30 }
 0x15d   : > { %484 = vmatpush.msra.mxu2 %v446_v33  ;;  %506 = vmatpush.msra.mxu3 %v447_v34 }
 0x15f   : > { %485 = vmatpush.msra.mxu2 %v444_v35  ;;  %507 = vmatpush.msra.mxu3 %v445_v36 }
 0x161   : > { %486 = vmatpush.msra.mxu2 %v442_v38  ;;  %508 = vmatpush.msra.mxu3 %v443_v39 }
 0x162   : > { %680 = vmatmul.msk.bf16.vlgmr.msra.gmra.mxu2 %vm467_vm1, %v690_v37  ;;  %681 = vmatmul.msk.bf16.vlgmr.msra.gmra.mxu3 %vm467_vm1, %v690_v37 }
 0x1e5   : > { %v488_v40 = vpop.f32.mrf.mxu2  ;;  %v510_v41 = vpop.f32.mrf.mxu3 }
 0x1e6   : > { %v489_v46 = vadd.f32 %v488_v40, %v455_v42  ;;  %v511_v47 = vadd.f32 %v510_v41, %v455_v42 }
 0x1e8   : > { %v515_v52 = vmax.f32 %v489_v46, 0.0  ;;  %v516_v53 = vmax.f32 %v511_v47, 0.0 }
 0x1ed   : > { %v490_v44 = vpop.f32.mrf.mxu2  ;;  %v512_v45 = vpop.f32.mrf.mxu3 }
 0x1ee   : > { %v491_v48 = vadd.f32 %v490_v44, %v460_v43  ;;  %v513_v49 = vadd.f32 %v512_v45, %v460_v43 }
 0x1f0   : > { %v517_v50 = vmax.f32 %v491_v48, 0.0  ;;  %v518_v51 = vmax.f32 %v513_v49, 0.0 }
 0x1f2   : > { %542 = vmatpush.msrb.mxu2 %v517_v50  ;;  %563 = vmatpush.msrb.mxu3 %v518_v51 }
 0x1f4   : > { %543 = vmatpush.msrb.mxu2 %v515_v52  ;;  %564 = vmatpush.msrb.mxu3 %v516_v53 }
 0x1f5   : > { %682 = vmatmul.msk.bf16.vlgmr.msrb.gmra.mxu2 %vm349_vm0, %v519_v54  ;;  %683 = vmatmul.msk.bf16.vlgmr.msrb.gmra.mxu3 %vm349_vm0, %v519_v54 }
 0x278   : > { %v545_v57 = vpop.f32.mrf.mxu2  ;;  %v566_v58 = vpop.f32.mrf.mxu3 }
 0x279   : > { %v567_v59 = vadd.f32 %v566_v58, %v523_v55  ;;  %v546_v60 = vadd.f32 %v545_v57, %v523_v55 }
 0x27b   : > { %v572_v61 = vrot.slane %v567_v59, 7 }
 0x27c   : > { %588 = sbr.rel (!%p878_p5) target bundleno = 670 (0x29e), region = 44 }
 0x27d   : > { %v574_v62 = vsel %vm573_vm2, %v546_v60, %v572_v61 }
 0x27e   : > { %580 = vst.msk [vmem:[%s230_s16] sm:$0x3] %vm578_vm3, %v574_v62 }
 0x280   : > { %v547_v63 = vpop.f32.mrf.mxu2  ;;  %v568_v0 = vpop.f32.mrf.mxu3 }
 0x281   : > { %s1049_s25 = smov (!%p591_p11, %s590_s25), 2 }
 0x282   : > { %s593_s26 = ssub.s32 2, %s1049_s25 }
 0x283   : > { %s594_s30 = sshll.u32 %s593_s26, 4 }
 0x284   : > { %595 = vsyncadd %s979_s17, %s594_s30  ;;  %p686_p12 = scmp.ne.s32.totalorder %s1049_s25, 0  ;;  %s597_s28 = scalar_lea.hbm %s1039_s5, %s685_s23 }
 0x285   : > { %s598_s8 = sshll.u32 %s1049_s25, 4  ;;  %s993_s9 = sshll.u32 %s230_s16, 4  ;;  %s600_s9 = int_to_ptr.vmem [resolvable:$true] %s993_s9 }
 0x286   : > { %s601_s22 = sshll.u32 %s597_s28, 4  ;;  %s733_s10 = sshra.s32 %s600_s9, 4  ;;  %s602_s22 = int_to_ptr.hbm [resolvable:$true] %s601_s22  ;;  %s734_s10 = int_to_ptr.vmem [resolvable:$true] %s733_s10 }
 0x287   : > { %s735_s11 = sshrl.u32 %s598_s8, 4  ;;  %s809_s13 = smov [#allocation2]  }
 0x288   : > { %s740_s12 = scalar_lea.vmem %s734_s10, %s735_s11  ;;  %s744_s14 = scalar_lea.vmem %s809_s13, 4 }
 0x289   : > { %p741_p13 = scmp.ne.s32.totalorder %s734_s10, %s740_s12  ;;  %p746_p2 = scmp.lt.s32.totalorder %s744_s14, %s740_s12 }
 0x28b   : > { %p742_p0 = pnand %p741_p13, %p686_p12 }
 0x28d   : > { %p743_p1 = pneg %p742_p0 }
 0x28f   : > { %p748_p3 = pnand %p746_p2, %p743_p1 }
 0x291   : > { %751 = shalt.err (!%p748_p3)
}
 0x292   : > { %s752_s15 = sshra.s32 %s602_s22, 4  ;;  %s763_s30 = scalar_lea.hbm %s1039_s5, 3  ;;  %s753_s15 = int_to_ptr.hbm [resolvable:$true] %s752_s15 }
 0x293   : > { %s759_s16 = scalar_lea.hbm %s753_s15, %s735_s11  ;;  %p764_p8 = scmp.lt.s32.totalorder %s753_s15, %s1039_s5 }
 0x294   : > { %p760_p4 = scmp.ne.s32.totalorder %s753_s15, %s759_s16  ;;  %p765_p9 = scmp.lt.s32.totalorder %s763_s30, %s759_s16 }
 0x296   : > { %p761_p5 = pnand %p760_p4, %p686_p12  ;;  %p766_p10 = por %p765_p9, %p764_p8 }
 0x298   : > { %p762_p7 = pneg %p761_p5 }
 0x29a   : > { %p767_p11 = pnand %p766_p10, %p762_p7 }
 0x29c   : > { %770 = shalt.err (!%p767_p11)
}
 0x29d   : > { %604 = dma.vmem_to_hbm [thread:$0]  (%p686_p12), %s600_s9, %s598_s8, %s602_s22, %s979_s17  }
 0x29e PF: > { %p696_p13 = scmp.ge.s32.totalorder %s806_s21, 2  ;;  %s613_s28 = sand.u32 1, %s794_s18  }
 0x29f   : > { %s614_s10 = scalar_lea.sflag [#allocation3], %s613_s28 }
 0x2a0   : > { %p693_p0 = pnand %p696_p13, %p882_p6 }
 0x2a2   : > { %p694_p1 = pneg %p693_p0 }
 0x2a4   : > { %789 = dma.done.wait (%p694_p1), %s614_s10, 32  }
 0x2a5   : > { %791 = vsyncadd (%p694_p1), %s614_s10, 4294967264  ;;  %p15_p2 = scmp.ge.s32.totalorder %s865_s24, 4   ;;  %s1042_s18 = smov %s798_s19 }
 0x2a6   : > { %s1043_s19 = smov %s802_s20  ;;  %s1044_s20 = smov %s876_s27 }
 0x2a7   : > { %s1045_s21 = smov %s865_s24  ;;  %17 = sbr.rel (!%p15_p2) target bundleno = 3 (0x3), region = 75 }
 0x2ac   :  { %620 = vsyncpa [#allocation3], 1 }
 0x2ad   :  { %622 = vsyncpa [#allocation3 + $0x1], 1 }

</bundles_post_ra>
